<compile_context>
chip_gen: v7x
topology: tpu7x:2x2x1
jax: 0.10.0
libtpu: 0.0.40
codegen_flags: <defaults>
</compile_context>

<pallas_src>
import functools

import jax
import jax.numpy as jnp
from jax.experimental import pallas as pl
from jax.experimental.pallas import tpu as pltpu


def _round_up(x: int, m: int) -> int:
    return ((x + m - 1) // m) * m


def _pad_dim(d: int) -> int:
    # Lane-dense feature dims. At large widths prefer 256-multiples for the
    # 256-wide v6e/v7x MXU; plain 128 for small dims to avoid wasting VMEM.
    return _round_up(d, 256) if d >= 1024 else _round_up(d, 128)


def _resident_block_spec(shape):
    """BlockSpec for a weight/bias block whose block index is constant (0,0):
    it stays resident in VMEM, so double-buffering it is pure VMEM waste --
    request a single buffer."""
    try:
        return pl.BlockSpec(shape, lambda i: (0, 0),
                            pipeline_mode=pl.Buffered(1))
    except TypeError:  # fallback if this jax version lacks pipeline_mode
        return pl.BlockSpec(shape, lambda i: (0, 0))


def _fused_mlp_kernel(*refs, n_layers: int):
    """(Linear -> ReLU)* -> Linear over one batch tile, all layers fused.

    refs = (x_ref, w0, b0, w1, b1, ..., o_ref)
      x_ref : (tm, D0p)        f32  VMEM (pipelined over batch tiles)
      wi    : (Dip, D_{i+1}p)  bf16 VMEM, resident (constant block index)
      bi    : (1,  D_{i+1}p)   f32  VMEM, resident
      o_ref : (tm, Dlastp)     f32  VMEM
    Intermediate activations live in vregs / compiler-managed VMEM; nothing
    intermediate is written back to HBM.
    """
    x_ref = refs[0]
    o_ref = refs[-1]
    wb = refs[1:-1]

    h = x_ref[...]                                   # f32 activation tile
    for i in range(n_layers):
        w_ref = wb[2 * i]
        b_ref = wb[2 * i + 1]
        # bf16 MXU matmul, f32 accumulation.
        h = jnp.dot(h.astype(jnp.bfloat16), w_ref[...],
                    preferred_element_type=jnp.float32)
        h = h + b_ref[...]                           # (1, D) broadcast, f32 VPU
        if i != n_layers - 1:
            h = jnp.maximum(h, 0.0)                  # ReLU, f32 epilogue
            # TODO(synk): training-mode Dropout(0.5) (pltpu.prng_random_bits
            # mask) not implemented; this matches nn.Dropout in eval mode.
    o_ref[...] = h.astype(o_ref.dtype)


def prepare_mlp_params(params):
    """Pad to lane-dense dims and cast weights to bf16 ONCE, outside the hot
    forward path. Padded rows/cols are exactly zero, so results are unchanged."""
    dims = [params[0][0].shape[0]] + [w.shape[1] for w, _ in params]
    dims_p = [_pad_dim(d) for d in dims]
    ws, bs = [], []
    for li, (w, b) in enumerate(params):
        d_in, d_out = w.shape
        wp = jnp.zeros((dims_p[li], dims_p[li + 1]), jnp.bfloat16)
        wp = wp.at[:d_in, :d_out].set(w.astype(jnp.bfloat16))
        bp = jnp.zeros((1, dims_p[li + 1]), jnp.float32)
        bp = bp.at[:, :d_out].set(b.reshape(1, -1).astype(jnp.float32))
        ws.append(wp)
        bs.append(bp)
    return tuple(ws), tuple(bs)


@functools.partial(jax.jit, static_argnames=("out_dim",))
def mlp_forward(x, padded_weights, padded_biases, out_dim):
    """Eval-mode forward of MLP: (Linear -> ReLU -> Dropout)* -> Linear."""
    B, D_in = x.shape
    n_layers = len(padded_weights)
    dims_p = [padded_weights[0].shape[0]] + [w.shape[1] for w in padded_weights]
    d0p, dlastp, dmaxp = dims_p[0], dims_p[-1], max(dims_p)

    # ---- VMEM budgeting (per TensorCore: the "parallel" grid axis duplicates
    # the resident weight set across v7x's 2 TCs; 64 MiB physical per TC). ----
    w_bytes = sum(w.size * 2 for w in padded_weights)   # bf16
    b_bytes = sum(b.size * 4 for b in padded_biases)    # f32
    budget = 48 << 20                                    # conservative per-TC
    # TODO(synk): layers whose padded bf16 weights exceed this budget need a
    # streaming K/N-tiled accumulator path (K grid axis marked "arbitrary",
    # pltpu.VMEM accumulator with pl.when init/finalize); demo sizes are
    # orders of magnitude below it, so assert here.
    assert w_bytes + b_bytes < budget, "resident weights exceed VMEM budget"

    # Batch tile: multiple of 16 (bf16 sublane packing); grow toward 512 when
    # batch and VMEM allow (fewer grid steps, fuller MXU, better pipelining).
    if B <= 128:
        tm = _round_up(B, 16)
    else:
        tm = 128
        for cand in (512, 256, 128):
            act = (2 * cand * d0p + 2 * cand * dlastp + 3 * cand * dmaxp) * 4
            if w_bytes + b_bytes + act <= budget:
                tm = cand
                break
    B_p = _round_up(B, tm)

    xp = jnp.zeros((B_p, d0p), jnp.float32).at[:B, :D_in].set(x)

    # x / out are pipelined over batch tiles (default double buffering);
    # weights/biases are resident single-buffer blocks.
    in_specs = [pl.BlockSpec((tm, d0p), lambda i: (i, 0))]
    flat_wb = []
    flops = 0
    for li in range(n_layers):
        wp, bp = padded_weights[li], padded_biases[li]
        flat_wb += [wp, bp]
        in_specs += [_resident_block_spec(wp.shape),
                     _resident_block_spec(bp.shape)]
        flops += 2 * B_p * wp.shape[0] * wp.shape[1]

    act_bytes = (2 * tm * d0p + 2 * tm * dlastp + 3 * tm * dmaxp) * 4
    footprint = w_bytes + b_bytes + act_bytes
    vmem_limit = int(min(64 << 20, max(footprint + (8 << 20), 16 << 20)))

    bytes_accessed = xp.size * 4 + w_bytes + b_bytes + B_p * dlastp * 4

    kernel = functools.partial(_fused_mlp_kernel, n_layers=n_layers)
    out_p = pl.pallas_call(
        kernel,
        out_shape=jax.ShapeDtypeStruct((B_p, dlastp), jnp.float32),
        grid_spec=pl.GridSpec(
            grid=(B_p // tm,),
            in_specs=in_specs,
            out_specs=pl.BlockSpec((tm, dlastp), lambda i: (i, 0)),
        ),
        compiler_params=pltpu.CompilerParams(
            # Batch tiles are independent -> shard across TensorCores.
            dimension_semantics=("parallel",),
            vmem_limit_bytes=vmem_limit,
        ),
        cost_estimate=pl.CostEstimate(
            flops=flops, transcendentals=0, bytes_accessed=bytes_accessed),
    )(xp, *flat_wb)

    return out_p[:B, :out_dim]


def init_mlp_params(key, input_dim, hidden_dims, output_dim):
    """Deterministic PyTorch-style (Kaiming-uniform-ish) init for each Linear."""
    dims = [input_dim] + list(hidden_dims) + [output_dim]
    params = []
    for d_in, d_out in zip(dims[:-1], dims[1:]):
        key, kw, kb = jax.random.split(key, 3)
        bound = 1.0 / jnp.sqrt(d_in)
        # stored as (d_in, d_out) -- transposed from PyTorch's (out, in)
        w = jax.random.uniform(kw, (d_in, d_out), jnp.float32, -bound, bound)
        b = jax.random.uniform(kb, (d_out,), jnp.float32, -bound, bound)
        params.append((w, b))
    return params


if __name__ == "__main__":
    key = jax.random.PRNGKey(0)
    key_x, key_p = jax.random.split(key)

    batch = 8
    input_dim = 32
    hidden_dims = [64, 32]
    output_dim = 16

    x = jax.random.normal(key_x, (batch, input_dim), jnp.float32)
    params = init_mlp_params(key_p, input_dim, hidden_dims, output_dim)

    # Pad + bf16-cast weights once (hoisted out of the forward path).
    padded_w, padded_b = prepare_mlp_params(params)

    out = mlp_forward(x, padded_w, padded_b, out_dim=output_dim)
    out = jax.block_until_ready(out)

    # sanity: compare against full-f32 plain-JAX reference
    # (eval-mode dropout = identity); tolerance accounts for bf16 matmul inputs
    ref = x
    for i, (w, b) in enumerate(params):
        ref = ref @ w + b.reshape(1, -1)
        if i != len(params) - 1:
            ref = jnp.maximum(ref, 0.0)

    assert out.shape == (batch, output_dim)
    err = float(jnp.max(jnp.abs(out - ref)))
    assert jnp.allclose(out, ref, atol=3e-2, rtol=3e-2), f"max abs err {err}"

    print("KERNEL_OK")
</pallas_src>

<mosaic_0001>
module attributes {stable_mosaic.version = 11 : i64} {
  func.func @_fused_mlp_kernel(%arg0: i32, %arg1: memref<16x128xf32, #tpu.memory_space<vmem>>, %arg2: memref<128x128xbf16, #tpu.memory_space<vmem>>, %arg3: memref<1x128xf32, #tpu.memory_space<vmem>>, %arg4: memref<128x128xbf16, #tpu.memory_space<vmem>>, %arg5: memref<1x128xf32, #tpu.memory_space<vmem>>, %arg6: memref<128x128xbf16, #tpu.memory_space<vmem>>, %arg7: memref<1x128xf32, #tpu.memory_space<vmem>>, %arg8: memref<16x128xf32, #tpu.memory_space<vmem>>) attributes {dimension_semantics = [#tpu.dimension_semantics<parallel>], iteration_bounds = array<i64: 1>, scalar_prefetch = 0 : i64, scratch_operands = 0 : i64, tpu.core_type = #tpu.core_type<tc>, window_params = [{transform_indices = @transform_0, window_bounds = array<i64: 16, 128>}, {pipeline_mode = #tpu.pipeline_mode<synchronous>, transform_indices = @transform_1, window_bounds = array<i64: 128, 128>}, {pipeline_mode = #tpu.pipeline_mode<synchronous>, transform_indices = @transform_2, window_bounds = array<i64: 1, 128>}, {pipeline_mode = #tpu.pipeline_mode<synchronous>, transform_indices = @transform_3, window_bounds = array<i64: 128, 128>}, {pipeline_mode = #tpu.pipeline_mode<synchronous>, transform_indices = @transform_4, window_bounds = array<i64: 1, 128>}, {pipeline_mode = #tpu.pipeline_mode<synchronous>, transform_indices = @transform_5, window_bounds = array<i64: 128, 128>}, {pipeline_mode = #tpu.pipeline_mode<synchronous>, transform_indices = @transform_6, window_bounds = array<i64: 1, 128>}, {transform_indices = @transform_7, window_bounds = array<i64: 16, 128>}]} {
    %c0 = arith.constant 0 : index
    %c0_0 = arith.constant 0 : index
    %0 = vector.load %arg1[%c0, %c0_0] : memref<16x128xf32, #tpu.memory_space<vmem>>, vector<16x128xf32>
    %1 = arith.truncf %0 : vector<16x128xf32> to vector<16x128xbf16>
    %c0_1 = arith.constant 0 : index
    %c0_2 = arith.constant 0 : index
    %2 = vector.load %arg2[%c0_1, %c0_2] : memref<128x128xbf16, #tpu.memory_space<vmem>>, vector<128x128xbf16>
    %cst = arith.constant dense<0.000000e+00> : vector<16x128xf32>
    %3 = tpu.matmul %1, %2, %cst {dimension_numbers = #tpu.dot_dimension_numbers<[1], [0], [0], [1], [0, 0, 1, 1], [], []>} : vector<16x128xbf16>, vector<128x128xbf16>, vector<16x128xf32> -> vector<16x128xf32>
    %c0_3 = arith.constant 0 : index
    %c0_4 = arith.constant 0 : index
    %4 = vector.load %arg3[%c0_3, %c0_4] : memref<1x128xf32, #tpu.memory_space<vmem>>, vector<1x128xf32>
    %5 = vector.broadcast %4 : vector<1x128xf32> to vector<16x128xf32>
    %6 = arith.addf %3, %5 : vector<16x128xf32>
    %cst_5 = arith.constant 0.000000e+00 : f32
    %7 = vector.broadcast %cst_5 : f32 to vector<16x128xf32>
    %8 = arith.maximumf %6, %7 : vector<16x128xf32>
    %9 = arith.truncf %8 : vector<16x128xf32> to vector<16x128xbf16>
    %c0_6 = arith.constant 0 : index
    %c0_7 = arith.constant 0 : index
    %10 = vector.load %arg4[%c0_6, %c0_7] : memref<128x128xbf16, #tpu.memory_space<vmem>>, vector<128x128xbf16>
    %cst_8 = arith.constant dense<0.000000e+00> : vector<16x128xf32>
    %11 = tpu.matmul %9, %10, %cst_8 {dimension_numbers = #tpu.dot_dimension_numbers<[1], [0], [0], [1], [0, 0, 1, 1], [], []>} : vector<16x128xbf16>, vector<128x128xbf16>, vector<16x128xf32> -> vector<16x128xf32>
    %c0_9 = arith.constant 0 : index
    %c0_10 = arith.constant 0 : index
    %12 = vector.load %arg5[%c0_9, %c0_10] : memref<1x128xf32, #tpu.memory_space<vmem>>, vector<1x128xf32>
    %13 = vector.broadcast %12 : vector<1x128xf32> to vector<16x128xf32>
    %14 = arith.addf %11, %13 : vector<16x128xf32>
    %cst_11 = arith.constant 0.000000e+00 : f32
    %15 = vector.broadcast %cst_11 : f32 to vector<16x128xf32>
    %16 = arith.maximumf %14, %15 : vector<16x128xf32>
    %17 = arith.truncf %16 : vector<16x128xf32> to vector<16x128xbf16>
    %c0_12 = arith.constant 0 : index
    %c0_13 = arith.constant 0 : index
    %18 = vector.load %arg6[%c0_12, %c0_13] : memref<128x128xbf16, #tpu.memory_space<vmem>>, vector<128x128xbf16>
    %cst_14 = arith.constant dense<0.000000e+00> : vector<16x128xf32>
    %19 = tpu.matmul %17, %18, %cst_14 {dimension_numbers = #tpu.dot_dimension_numbers<[1], [0], [0], [1], [0, 0, 1, 1], [], []>} : vector<16x128xbf16>, vector<128x128xbf16>, vector<16x128xf32> -> vector<16x128xf32>
    %c0_15 = arith.constant 0 : index
    %c0_16 = arith.constant 0 : index
    %20 = vector.load %arg7[%c0_15, %c0_16] : memref<1x128xf32, #tpu.memory_space<vmem>>, vector<1x128xf32>
    %21 = vector.broadcast %20 : vector<1x128xf32> to vector<16x128xf32>
    %22 = arith.addf %19, %21 : vector<16x128xf32>
    %c0_17 = arith.constant 0 : index
    %c0_18 = arith.constant 0 : index
    %23 = vector.load %arg8[%c0_17, %c0_18] : memref<16x128xf32, #tpu.memory_space<vmem>>, vector<16x128xf32>
    tpu.vector_store %arg8[%c0_17, %c0_18], %22 {strides = array<i32>} : memref<16x128xf32, #tpu.memory_space<vmem>>, vector<16x128xf32>,
    return
  }
  func.func @transform_0(%arg0: i32) -> (i32, i32) {
    %c0_i32 = arith.constant 0 : i32
    %c0_i32_0 = arith.constant 0 : i32
    return %arg0, %c0_i32 : i32, i32
  }
  func.func @transform_1(%arg0: i32) -> (i32, i32) {
    %c0_i32 = arith.constant 0 : i32
    %c0_i32_0 = arith.constant 0 : i32
    %c0_i32_1 = arith.constant 0 : i32
    return %c0_i32, %c0_i32_0 : i32, i32
  }
  func.func @transform_2(%arg0: i32) -> (i32, i32) {
    %c0_i32 = arith.constant 0 : i32
    %c0_i32_0 = arith.constant 0 : i32
    %c0_i32_1 = arith.constant 0 : i32
    return %c0_i32, %c0_i32_0 : i32, i32
  }
  func.func @transform_3(%arg0: i32) -> (i32, i32) {
    %c0_i32 = arith.constant 0 : i32
    %c0_i32_0 = arith.constant 0 : i32
    %c0_i32_1 = arith.constant 0 : i32
    return %c0_i32, %c0_i32_0 : i32, i32
  }
  func.func @transform_4(%arg0: i32) -> (i32, i32) {
    %c0_i32 = arith.constant 0 : i32
    %c0_i32_0 = arith.constant 0 : i32
    %c0_i32_1 = arith.constant 0 : i32
    return %c0_i32, %c0_i32_0 : i32, i32
  }
  func.func @transform_5(%arg0: i32) -> (i32, i32) {
    %c0_i32 = arith.constant 0 : i32
    %c0_i32_0 = arith.constant 0 : i32
    %c0_i32_1 = arith.constant 0 : i32
    return %c0_i32, %c0_i32_0 : i32, i32
  }
  func.func @transform_6(%arg0: i32) -> (i32, i32) {
    %c0_i32 = arith.constant 0 : i32
    %c0_i32_0 = arith.constant 0 : i32
    %c0_i32_1 = arith.constant 0 : i32
    return %c0_i32, %c0_i32_0 : i32, i32
  }
  func.func @transform_7(%arg0: i32) -> (i32, i32) {
    %c0_i32 = arith.constant 0 : i32
    %c0_i32_0 = arith.constant 0 : i32
    return %arg0, %c0_i32 : i32, i32
  }
}

</mosaic_0001>

<bundles_post_ra>
// kernel: mlp_forward.1
= control target key start
LH: loop header
LB: loop body
LE: loop exit
PB: predicated region body
PF: predicated region fallthrough
CT: control target
= control target key end

     0   :  { %12 = vsyncpa [#allocation3], 0  ;;  %s786_s0 = inlined_call_operand.vmem [shape: f32[16,128], index: 0, kind: input, shape index: {}]   ;;  %s787_s1 = inlined_call_operand.hbm [shape: bf16[128,128], index: 1, kind: input, shape index: {}]   ;;  %s788_s2 = inlined_call_operand.vmem [shape: f32[1,128], index: 2, kind: input, shape index: {}]   ;;  %s789_s3 = inlined_call_operand.hbm [shape: bf16[128,128], index: 3, kind: input, shape index: {}]   ;;  %s790_s4 = inlined_call_operand.vmem [shape: f32[1,128], index: 4, kind: input, shape index: {}]   ;;  %s791_s5 = inlined_call_operand.hbm [shape: bf16[128,128], index: 5, kind: input, shape index: {}]   ;;  %s792_s6 = inlined_call_operand.vmem [shape: f32[1,128], index: 6, kind: input, shape index: {}]   ;;  %s793_s7 = inlined_call_operand.vmem [shape: f32[16,128], index: 7, kind: output, shape index: {}]  }
   0x1   :  { %13 = vsyncpa [#allocation5], 0  ;;  %s636_s24 = smov [#allocation4]   ;;  %s637_s26 = smov [#allocation2]  }
   0x2   :  { %s35_s25 = sshll.u32 %s636_s24, 4  ;;  %s21_s27 = sshll.u32 %s637_s26, 4  ;;  %s36_s25 = int_to_ptr.vmem [resolvable:$true] %s35_s25  ;;  %s683_s27 = int_to_ptr.vmem [resolvable:$true] %s21_s27 }
   0x3   :  { %s566_s30 = scalar_lea.hbm %s789_s3, 1024 }
   0x4   :  { %p567_p0 = scmp.ne.s32.totalorder %s789_s3, %s566_s30  ;;  %p570_p1 = scmp.lt.u32.totalorder %s566_s30, %s789_s3 }
   0x6   :  { %p572_p2 = pnand %p570_p1, %p567_p0 }
   0x8   :  { %575 = shalt.err (!%p572_p2)
}
   0x9   :  { %s576_s12 = scalar_lea.vmem %s36_s25, 1024  ;;  %p581_p4 = scmp.lt.s32.totalorder %s36_s25, %s36_s25 }
   0xa   :  { %p577_p3 = scmp.ne.s32.totalorder %s36_s25, %s576_s12  ;;  %p582_p5 = scmp.lt.s32.totalorder %s576_s12, %s576_s12 }
   0xc   :  { %p583_p6 = por %p582_p5, %p581_p4 }
   0xe   :  { %p584_p7 = pnand %p583_p6, %p577_p3 }
  0x10   :  { %587 = shalt.err (!%p584_p7)
}
  0x11   :  { %s638_s13 = smov 64   ;;  %s639_s14 = smov 4  }
  0x12   :  { %41 = dma.hbm_to_vmem [thread:$0]  %s789_s3, 1024, %s36_s25, [#allocation5], %s638_s13, %s638_s13, %s639_s14  }
  0x13   :  { %s588_s19 = scalar_lea.hbm %s787_s1, 1024 }
  0x14   :  { %p589_p8 = scmp.ne.s32.totalorder %s787_s1, %s588_s19  ;;  %p592_p9 = scmp.lt.u32.totalorder %s588_s19, %s787_s1 }
  0x16   :  { %p594_p10 = pnand %p592_p9, %p589_p8 }
  0x18   :  { %597 = shalt.err (!%p594_p10)
}
  0x19   :  { %s598_s24 = scalar_lea.vmem %s683_s27, 1024  ;;  %p603_p12 = scmp.lt.s32.totalorder %s683_s27, %s683_s27 }
  0x1a   :  { %p599_p11 = scmp.ne.s32.totalorder %s683_s27, %s598_s24  ;;  %p604_p13 = scmp.lt.s32.totalorder %s598_s24, %s598_s24 }
  0x1c   :  { %p605_p0 = por %p604_p13, %p603_p12 }
  0x1e   :  { %p606_p1 = pnand %p605_p0, %p599_p11 }
  0x20   :  { %609 = shalt.err (!%p606_p1)
}
  0x21   :  { %27 = dma.hbm_to_vmem [thread:$0]  %s787_s1, 1024, %s683_s27, [#allocation3], %s638_s13, %s638_s13, %s639_s14  }
  0x22   :  { %s640_s26 = smov [#allocation6]   ;;  %s610_s8 = scalar_lea.hbm %s791_s5, 1024 }
  0x23   :  { %s49_s28 = sshll.u32 %s640_s26, 4  ;;  %p611_p2 = scmp.ne.s32.totalorder %s791_s5, %s610_s8  ;;  %s50_s28 = int_to_ptr.vmem [resolvable:$true] %s49_s28 }
  0x24   :  { %p614_p3 = scmp.lt.u32.totalorder %s610_s8, %s791_s5 }
  0x26   :  { %p616_p4 = pnand %p614_p3, %p611_p2 }
  0x28   :  { %619 = shalt.err (!%p616_p4)
}
  0x29   :  { %s620_s15 = scalar_lea.vmem %s50_s28, 1024  ;;  %p625_p6 = scmp.lt.s32.totalorder %s50_s28, %s50_s28 }
  0x2a   :  { %p621_p5 = scmp.ne.s32.totalorder %s50_s28, %s620_s15  ;;  %p626_p7 = scmp.lt.s32.totalorder %s620_s15, %s620_s15 }
  0x2c   :  { %p627_p8 = por %p626_p7, %p625_p6 }
  0x2e   :  { %p628_p9 = pnand %p627_p8, %p621_p5 }
  0x30   :  { %631 = shalt.err (!%p628_p9)
}
  0x31   :  { %55 = dma.hbm_to_vmem [thread:$0]  %s791_s5, 1024, %s50_s28, [#allocation5], %s638_s13, %s638_s13, %s639_s14  }
  0x32   :  { %632 = dma.done.wait [#allocation3], 1024  }
  0x33   :  { %633 = vsyncadd [#allocation3], 4294966272 }
  0x34   :  { %634 = dma.done.wait [#allocation5], 2048  }
  0x35   :  { %635 = vsyncadd [#allocation5], 4294965248  ;;  %v641_v0 = vmov 0.0   ;;  %vm642_vm0 = vmmov 0   ;;  %v542_v1 = vld [vmem:[#allocation2] sm:$0xff]   ;;  %v543_v2 = vld [vmem:[#allocation2 + $0x8] sm:$0xff]  }
  0x36   :  { %475 = vmatprep.subr.bf16.mxu0 %v641_v0  ;;  %491 = vmatprep.mubr.msk.bf16.mxu0 %vm642_vm0, %v641_v0  ;;  %v544_v3 = vld [vmem:[#allocation2 + $0x10] sm:$0xff]   ;;  %v550_v4 = vld [vmem:[#allocation4] sm:$0xff]   ;;  %v545_v5 = vld [vmem:[#allocation2 + $0x18] sm:$0xff]  }
  0x37   :  { %495 = vmatprep.subr.bf16.mxu1 %v641_v0  ;;  %511 = vmatprep.mubr.msk.bf16.mxu1 %vm642_vm0, %v641_v0  ;;  %v551_v6 = vld [vmem:[#allocation4 + $0x8] sm:$0xff]   ;;  %v546_v7 = vld [vmem:[#allocation2 + $0x20] sm:$0xff]   ;;  %v552_v8 = vld [vmem:[#allocation4 + $0x10] sm:$0xff]  }
  0x38   :  { %476 = vmatpush3.bf16.msra.mxu0 %v542_v1  ;;  %496 = vmatpush3.bf16.msra.mxu1 %v550_v4  ;;  %v547_v9 = vld [vmem:[#allocation2 + $0x28] sm:$0xff]   ;;  %v553_v10 = vld [vmem:[#allocation4 + $0x18] sm:$0xff]   ;;  %v548_v11 = vld [vmem:[#allocation2 + $0x30] sm:$0xff]  }
  0x39   :  { %477 = vmatprep.subr.bf16.mxu0 %v641_v0  ;;  %497 = vmatprep.subr.bf16.mxu1 %v641_v0  ;;  %v554_v12 = vld [vmem:[#allocation4 + $0x20] sm:$0xff]   ;;  %v549_v13 = vld [vmem:[#allocation2 + $0x38] sm:$0xff]   ;;  %v69_v15 = vld [vmem:[%s786_s0 + $0x8] sm:$0xff] }
  0x3a   :  { %v68_v14 = vld [vmem:[%s786_s0] sm:$0xff]  ;;  %v555_v16 = vld [vmem:[#allocation4 + $0x28] sm:$0xff]   ;;  %v556_v18 = vld [vmem:[#allocation4 + $0x30] sm:$0xff]  }
  0x3b   :  { %v70_v17 = vpack.c.bf16 %v69_v15, %v68_v14  ;;  %v557_v19 = vld [vmem:[#allocation4 + $0x38] sm:$0xff]   ;;  %v558_v20 = vld [vmem:[#allocation6] sm:$0xff]   ;;  %v559_v21 = vld [vmem:[#allocation6 + $0x8] sm:$0xff]  }
  0x3c   :  { %478 = vmatpush3.bf16.msra.mxu0 %v543_v2  ;;  %498 = vmatpush3.bf16.msra.mxu1 %v551_v6  ;;  %v560_v22 = vld [vmem:[#allocation6 + $0x10] sm:$0xff]   ;;  %v561_v23 = vld [vmem:[#allocation6 + $0x18] sm:$0xff]   ;;  %v562_v24 = vld [vmem:[#allocation6 + $0x20] sm:$0xff]  }
  0x3d   :  { %479 = vmatprep.subr.bf16.mxu0 %v641_v0  ;;  %499 = vmatprep.subr.bf16.mxu1 %v641_v0  ;;  %v563_v25 = vld [vmem:[#allocation6 + $0x28] sm:$0xff]   ;;  %v421_v26 = vld [vmem:[%s788_s2] ss:$0 sm:$0xff]  ;;  %v564_v36 = vld [vmem:[#allocation6 + $0x30] sm:$0xff]  }
  0x3e   :  { %v565_v37 = vld [vmem:[#allocation6 + $0x38] sm:$0xff]   ;;  %v430_v38 = vld [vmem:[%s790_s4] ss:$0 sm:$0xff] }
  0x3f   :  { %v439_v48 = vld [vmem:[%s792_s6] ss:$0 sm:$0xff] }
  0x40   :  { %480 = vmatpush3.bf16.msra.mxu0 %v544_v3  ;;  %500 = vmatpush3.bf16.msra.mxu1 %v552_v8 }
  0x41   :  { %481 = vmatprep.subr.bf16.mxu0 %v641_v0  ;;  %501 = vmatprep.subr.bf16.mxu1 %v641_v0 }
  0x44   :  { %482 = vmatpush3.bf16.msra.mxu0 %v545_v5  ;;  %502 = vmatpush3.bf16.msra.mxu1 %v553_v10 }
  0x45   :  { %483 = vmatprep.subr.bf16.mxu0 %v641_v0  ;;  %503 = vmatprep.subr.bf16.mxu1 %v641_v0 }
  0x48   :  { %484 = vmatpush3.bf16.msra.mxu0 %v546_v7  ;;  %504 = vmatpush3.bf16.msra.mxu1 %v554_v12 }
  0x49   :  { %485 = vmatprep.subr.bf16.mxu0 %v641_v0  ;;  %505 = vmatprep.subr.bf16.mxu1 %v641_v0 }
  0x4c   :  { %486 = vmatpush3.bf16.msra.mxu0 %v547_v9  ;;  %506 = vmatpush3.bf16.msra.mxu1 %v555_v16 }
  0x4d   :  { %487 = vmatprep.subr.bf16.mxu0 %v641_v0  ;;  %507 = vmatprep.subr.bf16.mxu1 %v641_v0 }
  0x50   :  { %488 = vmatpush3.bf16.msra.mxu0 %v548_v11  ;;  %508 = vmatpush3.bf16.msra.mxu1 %v556_v18 }
  0x51   :  { %489 = vmatprep.subr.bf16.mxu0 %v641_v0  ;;  %509 = vmatprep.subr.bf16.mxu1 %v641_v0 }
  0x54   :  { %490 = vmatpush3.bf16.msra.mxu0 %v549_v13  ;;  %510 = vmatpush3.bf16.msra.mxu1 %v557_v19 }
  0x55   :  { %515 = vmatprep.subr.bf16.mxu0 %v641_v0 }
  0x57   :  { %492 = vmatmul.mubr.bf16.vlgmr.msra.gmra.mrb[0].mxu0 %v70_v17 }
  0x58   :  { %531 = vmatprep.mubr.msk.bf16.mxu0 %vm642_vm0, %v641_v0  ;;  %516 = vmatpush3.bf16.msra.mxu0 %v558_v20 }
  0x59   :  { %517 = vmatprep.subr.bf16.mxu0 %v641_v0 }
  0x5c   :  { %518 = vmatpush3.bf16.msra.mxu0 %v559_v21 }
  0x5d   :  { %519 = vmatprep.subr.bf16.mxu0 %v641_v0 }
  0x60   :  { %520 = vmatpush3.bf16.msra.mxu0 %v560_v22 }
  0x61   :  { %521 = vmatprep.subr.bf16.mxu0 %v641_v0 }
  0x64   :  { %522 = vmatpush3.bf16.msra.mxu0 %v561_v23 }
  0x65   :  { %523 = vmatprep.subr.bf16.mxu0 %v641_v0 }
  0x68   :  { %524 = vmatpush3.bf16.msra.mxu0 %v562_v24 }
  0x69   :  { %525 = vmatprep.subr.bf16.mxu0 %v641_v0 }
  0x6c   :  { %526 = vmatpush3.bf16.msra.mxu0 %v563_v25 }
  0x6d   :  { %527 = vmatprep.subr.bf16.mxu0 %v641_v0 }
  0x70   :  { %528 = vmatpush3.bf16.msra.mxu0 %v564_v36 }
  0x71   :  { %529 = vmatprep.subr.bf16.mxu0 %v641_v0 }
  0x74   :  { %530 = vmatpush3.bf16.msra.mxu0 %v565_v37 }
 0x12a   :  { %v176_v27 = vpop.f32.mrb[0].mxu0 }
 0x12b   :  { %v177_v28 = vadd.f32 %v421_v26, %v176_v27  ;;  %v493_v29 = vpop.f32.mrb[1].mxu0 }
 0x12c   :  { %v179_v30 = vpop.f32.mrb[2].mxu0 }
 0x12d   :  { %v180_v31 = vadd.f32 %v421_v26, %v179_v30  ;;  %v494_v32 = vpop.f32.mrb[3].mxu0  ;;  %v183_v33 = vmax.f32 %v177_v28, 0.0 }
 0x12f   :  { %v184_v34 = vmax.f32 %v180_v31, 0.0 }
 0x131   :  { %v185_v35 = vpack.c.bf16 %v184_v34, %v183_v33 }
 0x133   :  { %512 = vmatmul.mubr.bf16.vlgmr.msra.gmra.mrb[0].mxu1 %v185_v35 }
 0x206   :  { %v291_v39 = vpop.f32.mrb[0].mxu1 }
 0x207   :  { %v292_v40 = vadd.f32 %v430_v38, %v291_v39  ;;  %v513_v41 = vpop.f32.mrb[1].mxu1 }
 0x208   :  { %v294_v42 = vpop.f32.mrb[2].mxu1 }
 0x209   :  { %v295_v43 = vadd.f32 %v430_v38, %v294_v42  ;;  %v514_v44 = vpop.f32.mrb[3].mxu1  ;;  %v298_v45 = vmax.f32 %v292_v40, 0.0 }
 0x20b   :  { %v299_v46 = vmax.f32 %v295_v43, 0.0 }
 0x20d   :  { %v300_v47 = vpack.c.bf16 %v299_v46, %v298_v45 }
 0x20f   :  { %532 = vmatmul.mubr.bf16.vlgmr.msra.gmra.mrb[4].mxu0 %v300_v47 }
 0x2e2   :  { %v406_v49 = vpop.f32.mrb[4].mxu0 }
 0x2e3   :  { %v407_v50 = vadd.f32 %v439_v48, %v406_v49  ;;  %v533_v51 = vpop.f32.mrb[5].mxu0 }
 0x2e4   :  { %v409_v52 = vpop.f32.mrb[6].mxu0 }
 0x2e5   :  { %413 = vst [vmem:[%s793_s7] sm:$0xff] %v407_v50  ;;  %v410_v53 = vadd.f32 %v439_v48, %v409_v52  ;;  %v534_v54 = vpop.f32.mrb[7].mxu0 }
 0x2e7   :  { %414 = vst [vmem:[%s793_s7 + $0x8] sm:$0xff] %v410_v53 }
 0x2e8   :  { %419 = vsyncpa [#allocation3], 1 }
 0x2e9   :  { %420 = vsyncpa [#allocation5], 1 }

</bundles_post_ra>
